<compile_context>
chip_gen: v7x
topology: tpu7x:2x2x1
jax: 0.10.0
libtpu: 0.0.40
codegen_flags: <defaults>
</compile_context>

<pallas_src>
import jax
import jax.numpy as jnp
from jax.experimental import pallas as pl
from jax.experimental.pallas import tpu as pltpu


# -----------------------------------------------------------------------------
# Kernel: one batch tile through all three layers. Weights are whole-array
# blocks with constant index_maps -> fetched once, resident across the grid.
# -----------------------------------------------------------------------------
def mlp_kernel(x_ref, w1_ref, b1_ref, w2_ref, b2_ref, w3_ref, b3_ref, o_ref):
    # Layer 1: (tb, 896)bf16 @ (896, 256)bf16 -> f32, + bias, ReLU
    h1 = jnp.dot(x_ref[...], w1_ref[...], preferred_element_type=jnp.float32)
    h1 = jnp.maximum(h1 + b1_ref[...], 0.0).astype(jnp.bfloat16)
    # Layer 2: (tb, 256)bf16 @ (256, 128)bf16 -> f32, + bias, ReLU
    h2 = jnp.dot(h1, w2_ref[...], preferred_element_type=jnp.float32)
    h2 = jnp.maximum(h2 + b2_ref[...], 0.0).astype(jnp.bfloat16)
    # Layer 3: (tb, 128)bf16 @ (128, 128)bf16 -> f32, + bias (no activation)
    out = jnp.dot(h2, w3_ref[...], preferred_element_type=jnp.float32)
    o_ref[...] = (out + b3_ref[...]).astype(o_ref.dtype)


def _round_up(x, m):
    return (x + m - 1) // m * m


def _pad_to(a, shape):
    return jnp.pad(a, [(0, t - s) for s, t in zip(a.shape, shape)])


# -----------------------------------------------------------------------------
# Wrapper: pads to lane-dense shapes, casts to bf16, tiles over batch.
# -----------------------------------------------------------------------------
def net_forward(x, w1, b1, w2, b2, w3, b3):
    B, d_in = x.shape            # (B, 784)
    h1_dim = w1.shape[1]         # 256
    h2_dim = w2.shape[1]         # 64
    n_out = w3.shape[1]          # 10

    # Lane-dense padded dims.
    d_in_p = _round_up(d_in, 128)     # 896
    h2_p = _round_up(h2_dim, 128)     # 128
    n_out_p = _round_up(n_out, 128)   # 128

    # Batch tile: 256 fills the v6e/v7x MXU; for tiny batches just round to 8.
    tile_b = min(256, _round_up(B, 8))
    B_pad = _round_up(B, tile_b)
    n_tiles = pl.cdiv(B_pad, tile_b)

    # Pad + cast parameters / activations (zero padding is math-neutral).
    x_p = _pad_to(x, (B_pad, d_in_p)).astype(jnp.bfloat16)
    w1_p = _pad_to(w1, (d_in_p, h1_dim)).astype(jnp.bfloat16)
    b1_p = b1.reshape(1, h1_dim).astype(jnp.float32)
    w2_p = _pad_to(w2, (h1_dim, h2_p)).astype(jnp.bfloat16)
    b2_p = _pad_to(b2.reshape(1, h2_dim), (1, h2_p)).astype(jnp.float32)
    w3_p = _pad_to(w3, (h2_p, n_out_p)).astype(jnp.bfloat16)
    b3_p = _pad_to(b3.reshape(1, n_out), (1, n_out_p)).astype(jnp.float32)

    const = lambda shape: pl.BlockSpec(shape, lambda i: (0,) * len(shape))

    out_p = pl.pallas_call(
        mlp_kernel,
        out_shape=jax.ShapeDtypeStruct((B_pad, n_out_p), jnp.float32),
        grid=(n_tiles,),
        in_specs=[
            pl.BlockSpec((tile_b, d_in_p), lambda i: (i, 0)),   # x: tiled over batch
            const(w1_p.shape), const(b1_p.shape),               # weights: VMEM-resident
            const(w2_p.shape), const(b2_p.shape),
            const(w3_p.shape), const(b3_p.shape),
        ],
        out_specs=pl.BlockSpec((tile_b, n_out_p), lambda i: (i, 0)),
        compiler_params=pltpu.CompilerParams(
            dimension_semantics=("parallel",),
        ),
    )(x_p, w1_p, b1_p, w2_p, b2_p, w3_p, b3_p)

    return out_p[:B, :n_out]


def init_linear(key, fan_in, fan_out):
    # Mimics PyTorch's default uniform(-1/sqrt(fan_in), +1/sqrt(fan_in)).
    kw, kb = jax.random.split(key)
    bound = 1.0 / jnp.sqrt(fan_in)
    w = jax.random.uniform(kw, (fan_in, fan_out), jnp.float32, -bound, bound)
    b = jax.random.uniform(kb, (1, fan_out), jnp.float32, -bound, bound)
    return w, b


if __name__ == "__main__":
    key = jax.random.PRNGKey(0)
    k_x, k1, k2, k3 = jax.random.split(key, 4)

    B = 8
    x = jax.random.normal(k_x, (B, 28 * 28), jnp.float32)

    w1, b1 = init_linear(k1, 28 * 28, 256)
    w2, b2 = init_linear(k2, 256, 64)
    w3, b3 = init_linear(k3, 64, 10)

    out = net_forward(x, w1, b1, w2, b2, w3, b3)
    out = jax.block_until_ready(out)

    # Pure-JAX reference using bf16-rounded inputs/weights (f32 accumulation),
    # mirroring the kernel's precision choices.
    bf = lambda a: a.astype(jnp.bfloat16).astype(jnp.float32)
    ref = jnp.maximum(bf(x) @ bf(w1) + b1, 0.0)
    ref = jnp.maximum(bf(ref) @ bf(w2) + b2, 0.0)
    ref = bf(ref) @ bf(w3) + b3

    assert out.shape == (B, 10)
    assert jnp.allclose(out, ref, atol=2e-2, rtol=2e-2), (
        float(jnp.max(jnp.abs(out - ref))))

    print("KERNEL_OK")
</pallas_src>

<mosaic_0001>
module attributes {stable_mosaic.version = 11 : i64} {
  func.func @mlp_kernel(%arg0: i32, %arg1: memref<8x896xbf16, #tpu.memory_space<vmem>>, %arg2: memref<896x256xbf16, #tpu.memory_space<vmem>>, %arg3: memref<1x256xf32, #tpu.memory_space<vmem>>, %arg4: memref<256x128xbf16, #tpu.memory_space<vmem>>, %arg5: memref<1x128xf32, #tpu.memory_space<vmem>>, %arg6: memref<128x128xbf16, #tpu.memory_space<vmem>>, %arg7: memref<1x128xf32, #tpu.memory_space<vmem>>, %arg8: memref<8x128xf32, #tpu.memory_space<vmem>>) attributes {dimension_semantics = [#tpu.dimension_semantics<parallel>], iteration_bounds = array<i64: 1>, scalar_prefetch = 0 : i64, scratch_operands = 0 : i64, tpu.core_type = #tpu.core_type<tc>, window_params = [{transform_indices = @transform_0, window_bounds = array<i64: 8, 896>}, {pipeline_mode = #tpu.pipeline_mode<synchronous>, transform_indices = @transform_1, window_bounds = array<i64: 896, 256>}, {pipeline_mode = #tpu.pipeline_mode<synchronous>, transform_indices = @transform_2, window_bounds = array<i64: 1, 256>}, {pipeline_mode = #tpu.pipeline_mode<synchronous>, transform_indices = @transform_3, window_bounds = array<i64: 256, 128>}, {pipeline_mode = #tpu.pipeline_mode<synchronous>, transform_indices = @transform_4, window_bounds = array<i64: 1, 128>}, {pipeline_mode = #tpu.pipeline_mode<synchronous>, transform_indices = @transform_5, window_bounds = array<i64: 128, 128>}, {pipeline_mode = #tpu.pipeline_mode<synchronous>, transform_indices = @transform_6, window_bounds = array<i64: 1, 128>}, {transform_indices = @transform_7, window_bounds = array<i64: 8, 128>}]} {
    %c0 = arith.constant 0 : index
    %c0_0 = arith.constant 0 : index
    %0 = vector.load %arg1[%c0, %c0_0] : memref<8x896xbf16, #tpu.memory_space<vmem>>, vector<8x896xbf16>
    %c0_1 = arith.constant 0 : index
    %c0_2 = arith.constant 0 : index
    %1 = vector.load %arg2[%c0_1, %c0_2] : memref<896x256xbf16, #tpu.memory_space<vmem>>, vector<896x256xbf16>
    %cst = arith.constant dense<0.000000e+00> : vector<8x256xf32>
    %2 = tpu.matmul %0, %1, %cst {dimension_numbers = #tpu.dot_dimension_numbers<[1], [0], [0], [1], [0, 0, 1, 1], [], []>} : vector<8x896xbf16>, vector<896x256xbf16>, vector<8x256xf32> -> vector<8x256xf32>
    %c0_3 = arith.constant 0 : index
    %c0_4 = arith.constant 0 : index
    %3 = vector.load %arg3[%c0_3, %c0_4] : memref<1x256xf32, #tpu.memory_space<vmem>>, vector<1x256xf32>
    %4 = vector.broadcast %3 : vector<1x256xf32> to vector<8x256xf32>
    %5 = arith.addf %2, %4 : vector<8x256xf32>
    %cst_5 = arith.constant 0.000000e+00 : f32
    %6 = vector.broadcast %cst_5 : f32 to vector<8x256xf32>
    %7 = arith.maximumf %5, %6 : vector<8x256xf32>
    %8 = arith.truncf %7 : vector<8x256xf32> to vector<8x256xbf16>
    %c0_6 = arith.constant 0 : index
    %c0_7 = arith.constant 0 : index
    %9 = vector.load %arg4[%c0_6, %c0_7] : memref<256x128xbf16, #tpu.memory_space<vmem>>, vector<256x128xbf16>
    %cst_8 = arith.constant dense<0.000000e+00> : vector<8x128xf32>
    %10 = tpu.matmul %8, %9, %cst_8 {dimension_numbers = #tpu.dot_dimension_numbers<[1], [0], [0], [1], [0, 0, 1, 1], [], []>} : vector<8x256xbf16>, vector<256x128xbf16>, vector<8x128xf32> -> vector<8x128xf32>
    %c0_9 = arith.constant 0 : index
    %c0_10 = arith.constant 0 : index
    %11 = vector.load %arg5[%c0_9, %c0_10] : memref<1x128xf32, #tpu.memory_space<vmem>>, vector<1x128xf32>
    %12 = vector.broadcast %11 : vector<1x128xf32> to vector<8x128xf32>
    %13 = arith.addf %10, %12 : vector<8x128xf32>
    %cst_11 = arith.constant 0.000000e+00 : f32
    %14 = vector.broadcast %cst_11 : f32 to vector<8x128xf32>
    %15 = arith.maximumf %13, %14 : vector<8x128xf32>
    %16 = arith.truncf %15 : vector<8x128xf32> to vector<8x128xbf16>
    %c0_12 = arith.constant 0 : index
    %c0_13 = arith.constant 0 : index
    %17 = vector.load %arg6[%c0_12, %c0_13] : memref<128x128xbf16, #tpu.memory_space<vmem>>, vector<128x128xbf16>
    %cst_14 = arith.constant dense<0.000000e+00> : vector<8x128xf32>
    %18 = tpu.matmul %16, %17, %cst_14 {dimension_numbers = #tpu.dot_dimension_numbers<[1], [0], [0], [1], [0, 0, 1, 1], [], []>} : vector<8x128xbf16>, vector<128x128xbf16>, vector<8x128xf32> -> vector<8x128xf32>
    %c0_15 = arith.constant 0 : index
    %c0_16 = arith.constant 0 : index
    %19 = vector.load %arg7[%c0_15, %c0_16] : memref<1x128xf32, #tpu.memory_space<vmem>>, vector<1x128xf32>
    %20 = vector.broadcast %19 : vector<1x128xf32> to vector<8x128xf32>
    %21 = arith.addf %18, %20 : vector<8x128xf32>
    %c0_17 = arith.constant 0 : index
    %c0_18 = arith.constant 0 : index
    %22 = vector.load %arg8[%c0_17, %c0_18] : memref<8x128xf32, #tpu.memory_space<vmem>>, vector<8x128xf32>
    tpu.vector_store %arg8[%c0_17, %c0_18], %21 {strides = array<i32>} : memref<8x128xf32, #tpu.memory_space<vmem>>, vector<8x128xf32>,
    return
  }
  func.func @transform_0(%arg0: i32) -> (i32, i32) {
    %c0_i32 = arith.constant 0 : i32
    %c0_i32_0 = arith.constant 0 : i32
    return %arg0, %c0_i32 : i32, i32
  }
  func.func @transform_1(%arg0: i32) -> (i32, i32) {
    %c0_i32 = arith.constant 0 : i32
    %c0_i32_0 = arith.constant 0 : i32
    %c0_i32_1 = arith.constant 0 : i32
    return %c0_i32, %c0_i32_0 : i32, i32
  }
  func.func @transform_2(%arg0: i32) -> (i32, i32) {
    %c0_i32 = arith.constant 0 : i32
    %c0_i32_0 = arith.constant 0 : i32
    %c0_i32_1 = arith.constant 0 : i32
    return %c0_i32, %c0_i32_0 : i32, i32
  }
  func.func @transform_3(%arg0: i32) -> (i32, i32) {
    %c0_i32 = arith.constant 0 : i32
    %c0_i32_0 = arith.constant 0 : i32
    %c0_i32_1 = arith.constant 0 : i32
    return %c0_i32, %c0_i32_0 : i32, i32
  }
  func.func @transform_4(%arg0: i32) -> (i32, i32) {
    %c0_i32 = arith.constant 0 : i32
    %c0_i32_0 = arith.constant 0 : i32
    %c0_i32_1 = arith.constant 0 : i32
    return %c0_i32, %c0_i32_0 : i32, i32
  }
  func.func @transform_5(%arg0: i32) -> (i32, i32) {
    %c0_i32 = arith.constant 0 : i32
    %c0_i32_0 = arith.constant 0 : i32
    %c0_i32_1 = arith.constant 0 : i32
    return %c0_i32, %c0_i32_0 : i32, i32
  }
  func.func @transform_6(%arg0: i32) -> (i32, i32) {
    %c0_i32 = arith.constant 0 : i32
    %c0_i32_0 = arith.constant 0 : i32
    %c0_i32_1 = arith.constant 0 : i32
    return %c0_i32, %c0_i32_0 : i32, i32
  }
  func.func @transform_7(%arg0: i32) -> (i32, i32) {
    %c0_i32 = arith.constant 0 : i32
    %c0_i32_0 = arith.constant 0 : i32
    return %arg0, %c0_i32 : i32, i32
  }
}

</mosaic_0001>

<bundles_post_ra>
// kernel: tpu_custom_call.1
= control target key start
LH: loop header
LB: loop body
LE: loop exit
PB: predicated region body
PF: predicated region fallthrough
CT: control target
= control target key end

     0   :  { %12 = vsyncpa [#allocation3], 0  ;;  %s1938_s0 = inlined_call_operand.hbm [shape: bf16[8,896], index: 0, kind: input, shape index: {}]   ;;  %s1939_s1 = inlined_call_operand.hbm [shape: bf16[896,256], index: 1, kind: input, shape index: {}]   ;;  %s1940_s2 = inlined_call_operand.vmem [shape: f32[1,256], index: 2, kind: input, shape index: {}]   ;;  %s1941_s3 = inlined_call_operand.hbm [shape: bf16[256,128], index: 3, kind: input, shape index: {}]   ;;  %s1942_s4 = inlined_call_operand.vmem [shape: f32[1,128], index: 4, kind: input, shape index: {}]   ;;  %s1943_s5 = inlined_call_operand.hbm [shape: bf16[128,128], index: 5, kind: input, shape index: {}]   ;;  %s1944_s6 = inlined_call_operand.vmem [shape: f32[1,128], index: 6, kind: input, shape index: {}]   ;;  %s1945_s7 = inlined_call_operand.hbm [shape: f32[8,128], index: 7, kind: output, shape index: {}]  }
   0x1   :  { %13 = vsyncpa [#allocation6], 0 }
   0x2   :  { %14 = vsyncpa [#allocation9], 0 }
   0x3   :  { %15 = vsyncpa [#allocation4], 0  ;;  %s1805_s24 = smov [#allocation5]   ;;  %s1687_s28 = scalar_lea.hbm %s1939_s1, 14336 }
   0x4   :  { %s31_s25 = sshll.u32 %s1805_s24, 4  ;;  %p1688_p0 = scmp.ne.s32.totalorder %s1939_s1, %s1687_s28  ;;  %s32_s25 = int_to_ptr.vmem [resolvable:$true] %s31_s25 }
   0x5   :  { %p1691_p1 = scmp.lt.u32.totalorder %s1687_s28, %s1939_s1 }
   0x7   :  { %p1693_p2 = pnand %p1691_p1, %p1688_p0 }
   0x9   :  { %1696 = shalt.err (!%p1693_p2)
}
   0xa   :  { %s1697_s10 = scalar_lea.vmem %s32_s25, 14336  ;;  %p1702_p4 = scmp.lt.s32.totalorder %s32_s25, %s32_s25 }
   0xb   :  { %p1698_p3 = scmp.ne.s32.totalorder %s32_s25, %s1697_s10  ;;  %p1703_p5 = scmp.lt.s32.totalorder %s1697_s10, %s1697_s10 }
   0xd   :  { %p1704_p6 = por %p1703_p5, %p1702_p4 }
   0xf   :  { %p1705_p7 = pnand %p1704_p6, %p1698_p3 }
  0x11   :  { %1708 = shalt.err (!%p1705_p7)
}
  0x12   :  { %s1806_s11 = smov 128   ;;  %s1807_s12 = smov 8  }
  0x13   :  { %37 = dma.hbm_to_vmem [thread:$0]  %s1939_s1, 14336, %s32_s25, [#allocation6], %s1806_s11, %s1806_s11, %s1807_s12  }
  0x14   :  { %s1808_s15 = smov [#allocation2]   ;;  %s1809_s17 = smov [#allocation7]  }
  0x15   :  { %s22_s16 = sshll.u32 %s1808_s15, 4  ;;  %s45_s18 = sshll.u32 %s1809_s17, 4  ;;  %s23_s16 = int_to_ptr.vmem [resolvable:$true] %s22_s16  ;;  %s46_s18 = int_to_ptr.vmem [resolvable:$true] %s45_s18 }
  0x16   :  { %s1709_s21 = scalar_lea.hbm %s1938_s0, 448 }
  0x17   :  { %p1710_p8 = scmp.ne.s32.totalorder %s1938_s0, %s1709_s21  ;;  %p1713_p9 = scmp.lt.u32.totalorder %s1709_s21, %s1938_s0 }
  0x19   :  { %p1715_p10 = pnand %p1713_p9, %p1710_p8 }
  0x1b   :  { %1718 = shalt.err (!%p1715_p10)
}
  0x1c   :  { %s1719_s1 = scalar_lea.vmem %s23_s16, 448  ;;  %p1724_p12 = scmp.lt.s32.totalorder %s23_s16, %s23_s16 }
  0x1d   :  { %p1720_p11 = scmp.ne.s32.totalorder %s23_s16, %s1719_s1  ;;  %p1725_p13 = scmp.lt.s32.totalorder %s1719_s1, %s1719_s1 }
  0x1f   :  { %p1726_p0 = por %p1725_p13, %p1724_p12 }
  0x21   :  { %p1727_p1 = pnand %p1726_p0, %p1720_p11 }
  0x23   :  { %1730 = shalt.err (!%p1727_p1)
}
  0x24   :  { %25 = dma.hbm_to_vmem [thread:$0]  %s1938_s0, 448, %s23_s16, [#allocation3]  }
  0x25   :  { %s1731_s30 = scalar_lea.hbm %s1941_s3, 2048 }
  0x26   :  { %p1732_p2 = scmp.ne.s32.totalorder %s1941_s3, %s1731_s30  ;;  %p1735_p3 = scmp.lt.u32.totalorder %s1731_s30, %s1941_s3 }
  0x28   :  { %p1737_p4 = pnand %p1735_p3, %p1732_p2 }
  0x2a   :  { %1740 = shalt.err (!%p1737_p4)
}
  0x2b   :  { %s1741_s12 = scalar_lea.vmem %s46_s18, 2048  ;;  %p1746_p6 = scmp.lt.s32.totalorder %s46_s18, %s46_s18 }
  0x2c   :  { %p1742_p5 = scmp.ne.s32.totalorder %s46_s18, %s1741_s12  ;;  %p1747_p7 = scmp.lt.s32.totalorder %s1741_s12, %s1741_s12 }
  0x2e   :  { %p1748_p8 = por %p1747_p7, %p1746_p6 }
  0x30   :  { %p1749_p9 = pnand %p1748_p8, %p1742_p5 }
  0x32   :  { %1752 = shalt.err (!%p1749_p9)
}
  0x33   :  { %s1810_s0 = smov 64   ;;  %s1811_s13 = smov 4  }
  0x34   :  { %51 = dma.hbm_to_vmem [thread:$0]  %s1941_s3, 2048, %s46_s18, [#allocation6], %s1810_s0, %s1810_s0, %s1811_s13  }
  0x35   :  { %s1812_s16 = smov [#allocation8]   ;;  %s1753_s21 = scalar_lea.hbm %s1943_s5, 1024 }
  0x36   :  { %s59_s17 = sshll.u32 %s1812_s16, 4  ;;  %p1754_p10 = scmp.ne.s32.totalorder %s1943_s5, %s1753_s21  ;;  %s60_s17 = int_to_ptr.vmem [resolvable:$true] %s59_s17 }
  0x37   :  { %p1757_p11 = scmp.lt.u32.totalorder %s1753_s21, %s1943_s5 }
  0x39   :  { %p1759_p12 = pnand %p1757_p11, %p1754_p10 }
  0x3b   :  { %1762 = shalt.err (!%p1759_p12)
}
  0x3c   :  { %s1763_s1 = scalar_lea.vmem %s60_s17, 1024  ;;  %p1768_p0 = scmp.lt.s32.totalorder %s60_s17, %s60_s17 }
  0x3d   :  { %p1764_p13 = scmp.ne.s32.totalorder %s60_s17, %s1763_s1  ;;  %p1769_p1 = scmp.lt.s32.totalorder %s1763_s1, %s1763_s1 }
  0x3f   :  { %p1770_p2 = por %p1769_p1, %p1768_p0 }
  0x41   :  { %p1771_p3 = pnand %p1770_p2, %p1764_p13 }
  0x43   :  { %1774 = shalt.err (!%p1771_p3)
}
  0x44   :  { %65 = dma.hbm_to_vmem [thread:$0]  %s1943_s5, 1024, %s60_s17, [#allocation9], %s1810_s0, %s1810_s0, %s1811_s13  }
  0x45   :  { %1797 = dma.done.wait [#allocation3], 448  }
  0x46   :  { %1798 = vsyncadd [#allocation3], 4294966848 }
  0x47   :  { %1799 = dma.done.wait [#allocation6], 16384  }
  0x48   :  { %1800 = vsyncadd [#allocation6], 4294950912 }
  0x49   :  { %1801 = dma.done.wait [#allocation9], 1024  }
  0x4a   :  { %1802 = vsyncadd [#allocation9], 4294966272  ;;  %v1488_v0 = vld [vmem:[#allocation5 + $0x104] ss:$8 sps:$4 sm:$0xff]   ;;  %v1490_v1 = vld [vmem:[#allocation5 + $0x100] ss:$8 sps:$4 sm:$0xff]  }
  0x4b   :  { %835 = vmatprep.subr.bf16.mxu0 %v1488_v0  ;;  %v1491_v2 = vld [vmem:[#allocation5 + $0x114] ss:$8 sps:$4 sm:$0xff]   ;;  %v1493_v3 = vld [vmem:[#allocation5 + $0x110] ss:$8 sps:$4 sm:$0xff]   ;;  %v1494_v4 = vld [vmem:[#allocation5 + $0x124] ss:$8 sps:$4 sm:$0xff]  }
  0x4c   :  { %836 = vmatpush1.bf16.msra.mxu0 %v1490_v1  ;;  %v1496_v5 = vld [vmem:[#allocation5 + $0x120] ss:$8 sps:$4 sm:$0xff]   ;;  %v1497_v6 = vld [vmem:[#allocation5 + $0x134] ss:$8 sps:$4 sm:$0xff]   ;;  %v1499_v7 = vld [vmem:[#allocation5 + $0x130] ss:$8 sps:$4 sm:$0xff]  }
  0x4d   :  { %837 = vmatprep.subr.bf16.mxu0 %v1491_v2  ;;  %v1500_v8 = vld [vmem:[#allocation5 + $0x144] ss:$8 sps:$4 sm:$0xff]   ;;  %v1502_v9 = vld [vmem:[#allocation5 + $0x140] ss:$8 sps:$4 sm:$0xff]   ;;  %v1503_v10 = vld [vmem:[#allocation5 + $0x154] ss:$8 sps:$4 sm:$0xff]  }
  0x4e   :  { %v1505_v11 = vld [vmem:[#allocation5 + $0x150] ss:$8 sps:$4 sm:$0xff]   ;;  %v1506_v12 = vld [vmem:[#allocation5 + $0x164] ss:$8 sps:$4 sm:$0xff]   ;;  %v1508_v15 = vld [vmem:[#allocation5 + $0x160] ss:$8 sps:$4 sm:$0xff]  }
  0x4f   :  { %v1905_v13 = vld [vmem:[#allocation2 + $0x8] sm:$0xff]  ;;  %v1509_v16 = vld [vmem:[#allocation5 + $0x174] ss:$8 sps:$4 sm:$0xff]   ;;  %v1514_v19 = vld [vmem:[#allocation5 + $0x180] ss:$8 sps:$4 sm:$0xff]   ;;  %vm1815_vm0 = vmmov 0  }
  0x50   :  { %838 = vmatpush1.bf16.msra.mxu0 %v1493_v3  ;;  %v1271_v14 = vcombine.high %v1905_v13, %v1905_v13  ;;  %v1511_v17 = vld [vmem:[#allocation5 + $0x170] ss:$8 sps:$4 sm:$0xff]   ;;  %v1512_v18 = vld [vmem:[#allocation5 + $0x184] ss:$8 sps:$4 sm:$0xff]   ;;  %v1515_v20 = vld [vmem:[#allocation5 + $0x194] ss:$8 sps:$4 sm:$0xff]   ;;  %v1270_v54 = vcombine.low %v1905_v13, %v1905_v13 }
  0x51   :  { %839 = vmatprep.subr.bf16.mxu0 %v1494_v4  ;;  %v1559_v21 = vld [vmem:[#allocation5 + $0x4] ss:$8 sps:$4 sm:$0xff]   ;;  %v1561_v22 = vld [vmem:[#allocation5] ss:$8 sps:$4 sm:$0xff]   ;;  %v1565_v23 = vld [vmem:[#allocation5 + $0x14] ss:$8 sps:$4 sm:$0xff]  }
  0x52   :  { %867 = vmatprep.mubr.bf16.mxu0 %v1271_v14  ;;  %794 = vmatprep.subr.bf16.mxu1 %v1559_v21  ;;  %v1567_v24 = vld [vmem:[#allocation5 + $0x10] ss:$8 sps:$4 sm:$0xff]   ;;  %v1518_v26 = vld [vmem:[#allocation5 + $0x1a4] ss:$8 sps:$4 sm:$0xff]   ;;  %v1520_v28 = vld [vmem:[#allocation5 + $0x1a0] ss:$8 sps:$4 sm:$0xff]  }
  0x53   :  { %795 = vmatpush1.bf16.msra.mxu1 %v1561_v22  ;;  %v1517_v25 = vld [vmem:[#allocation5 + $0x190] ss:$8 sps:$4 sm:$0xff]   ;;  %v1571_v27 = vld [vmem:[#allocation5 + $0x24] ss:$8 sps:$4 sm:$0xff]   ;;  %v1573_v29 = vld [vmem:[#allocation5 + $0x20] ss:$8 sps:$4 sm:$0xff]  }
  0x54   :  { %840 = vmatpush1.bf16.msra.mxu0 %v1496_v5  ;;  %796 = vmatprep.subr.bf16.mxu1 %v1565_v23  ;;  %v1577_v30 = vld [vmem:[#allocation5 + $0x34] ss:$8 sps:$4 sm:$0xff]   ;;  %v1523_v32 = vld [vmem:[#allocation5 + $0x1b0] ss:$8 sps:$4 sm:$0xff]   ;;  %v1583_v34 = vld [vmem:[#allocation5 + $0x44] ss:$8 sps:$4 sm:$0xff]  }
  0x55   :  { %841 = vmatprep.subr.bf16.mxu0 %v1497_v6  ;;  %v1521_v31 = vld [vmem:[#allocation5 + $0x1b4] ss:$8 sps:$4 sm:$0xff]   ;;  %v1579_v33 = vld [vmem:[#allocation5 + $0x30] ss:$8 sps:$4 sm:$0xff]   ;;  %v1524_v35 = vld [vmem:[#allocation5 + $0x1c4] ss:$8 sps:$4 sm:$0xff]  }
  0x56   :  { %v1526_v36 = vld [vmem:[#allocation5 + $0x1c0] ss:$8 sps:$4 sm:$0xff]   ;;  %v1589_v38 = vld [vmem:[#allocation5 + $0x54] ss:$8 sps:$4 sm:$0xff]   ;;  %v1529_v40 = vld [vmem:[#allocation5 + $0x1d0] ss:$8 sps:$4 sm:$0xff]  }
  0x57   :  { %797 = vmatpush1.bf16.msra.mxu1 %v1567_v24  ;;  %v1585_v37 = vld [vmem:[#allocation5 + $0x40] ss:$8 sps:$4 sm:$0xff]   ;;  %v1527_v39 = vld [vmem:[#allocation5 + $0x1d4] ss:$8 sps:$4 sm:$0xff]   ;;  %v1591_v41 = vld [vmem:[#allocation5 + $0x50] ss:$8 sps:$4 sm:$0xff]  }
  0x58   :  { %842 = vmatpush1.bf16.msra.mxu0 %v1499_v7  ;;  %798 = vmatprep.subr.bf16.mxu1 %v1571_v27  ;;  %v1595_v42 = vld [vmem:[#allocation5 + $0x64] ss:$8 sps:$4 sm:$0xff]   ;;  %v1532_v44 = vld [vmem:[#allocation5 + $0x1e0] ss:$8 sps:$4 sm:$0xff]   ;;  %v1601_v46 = vld [vmem:[#allocation5 + $0x74] ss:$8 sps:$4 sm:$0xff]  }
  0x59   :  { %843 = vmatprep.subr.bf16.mxu0 %v1500_v8  ;;  %v1530_v43 = vld [vmem:[#allocation5 + $0x1e4] ss:$8 sps:$4 sm:$0xff]   ;;  %v1597_v45 = vld [vmem:[#allocation5 + $0x60] ss:$8 sps:$4 sm:$0xff]   ;;  %v1533_v47 = vld [vmem:[#allocation5 + $0x1f4] ss:$8 sps:$4 sm:$0xff]  }
  0x5a   :  { %v1535_v48 = vld [vmem:[#allocation5 + $0x1f0] ss:$8 sps:$4 sm:$0xff]   ;;  %v1607_v50 = vld [vmem:[#allocation5 + $0x84] ss:$8 sps:$4 sm:$0xff]   ;;  %v1538_v52 = vld [vmem:[#allocation5 + $0x200] ss:$8 sps:$4 sm:$0xff]  }
  0x5b   :  { %799 = vmatpush1.bf16.msra.mxu1 %v1573_v29  ;;  %v1603_v49 = vld [vmem:[#allocation5 + $0x70] ss:$8 sps:$4 sm:$0xff]   ;;  %v1540_v51 = vld [vmem:[#allocation5 + $0x204] ss:$8 sps:$4 sm:$0xff]   ;;  %v1609_v55 = vld [vmem:[#allocation5 + $0x80] ss:$8 sps:$4 sm:$0xff]  }
  0x5c   :  { %844 = vmatpush1.bf16.msra.mxu0 %v1502_v9  ;;  %800 = vmatprep.subr.bf16.mxu1 %v1577_v30  ;;  %v1909_v53 = vld [vmem:[#allocation2 + $0x10] sm:$0xff]  ;;  %v1621_v61 = vld [vmem:[#allocation5 + $0xa4] ss:$8 sps:$4 sm:$0xff]   ;;  %v1544_v63 = vld [vmem:[#allocation5 + $0x220] ss:$8 sps:$4 sm:$0xff]   ;;  %s1816_s30 = smov [#allocation10]  }
  0x5d   :  { %845 = vmatprep.subr.bf16.mxu0 %v1503_v10  ;;  %v1613_v56 = vld [vmem:[#allocation5 + $0x94] ss:$8 sps:$4 sm:$0xff]   ;;  %v1273_v58 = vcombine.high %v1909_v53, %v1909_v53  ;;  %v1541_v59 = vld [vmem:[#allocation5 + $0x210] ss:$8 sps:$4 sm:$0xff]   ;;  %v1546_v62 = vld [vmem:[#allocation5 + $0x224] ss:$8 sps:$4 sm:$0xff]  }
  0x5e   :  { %v1543_v57 = vld [vmem:[#allocation5 + $0x214] ss:$8 sps:$4 sm:$0xff]   ;;  %v1615_v60 = vld [vmem:[#allocation5 + $0x90] ss:$8 sps:$4 sm:$0xff]   ;;  %v1623_v0 = vld [vmem:[#allocation5 + $0xa0] ss:$8 sps:$4 sm:$0xff]  }
  0x5f   :  { %801 = vmatpush1.bf16.msra.mxu1 %v1579_v33  ;;  %v1627_v1 = vld [vmem:[#allocation5 + $0xb4] ss:$8 sps:$4 sm:$0xff]   ;;  %v1629_v3 = vld [vmem:[#allocation5 + $0xb0] ss:$8 sps:$4 sm:$0xff]   ;;  %v81_v4 = vld [vmem:[#allocation2] sm:$0xff]  ;;  %s1257_s8 = sshll.u32 %s1816_s30, 4  ;;  %s1258_s8 = int_to_ptr.vmem [resolvable:$true] %s1257_s8 }
  0x60   :  { %846 = vmatpush1.bf16.msra.mxu0 %v1505_v11  ;;  %802 = vmatprep.subr.bf16.mxu1 %v1583_v34  ;;  %v1549_v2 = vld [vmem:[#allocation5 + $0x234] ss:$8 sps:$4 sm:$0xff]   ;;  %v1547_v5 = vld [vmem:[#allocation5 + $0x230] ss:$8 sps:$4 sm:$0xff]   ;;  %v1633_v6 = vld [vmem:[#allocation5 + $0xc4] ss:$8 sps:$4 sm:$0xff]   ;;  %v1269_v7 = vcombine.high %v81_v4, %v81_v4  ;;  %v1268_v27 = vcombine.low %v81_v4, %v81_v4  ;;  %p1780_p5 = scmp.lt.s32.totalorder %s1258_s8, %s1258_s8 }
  0x61   :  { %847 = vmatprep.subr.bf16.mxu0 %v1506_v12  ;;  %v1552_v8 = vld [vmem:[#allocation5 + $0x244] ss:$8 sps:$4 sm:$0xff]   ;;  %v1550_v9 = vld [vmem:[#allocation5 + $0x240] ss:$8 sps:$4 sm:$0xff]   ;;  %v1639_v11 = vld [vmem:[#allocation5 + $0xd4] ss:$8 sps:$4 sm:$0xff]  }
  0x62   :  { %826 = vmatprep.mubr.bf16.mxu1 %v1269_v7  ;;  %v1635_v10 = vld [vmem:[#allocation5 + $0xc0] ss:$8 sps:$4 sm:$0xff]   ;;  %v1555_v12 = vld [vmem:[#allocation5 + $0x254] ss:$8 sps:$4 sm:$0xff]   ;;  %v1553_v13 = vld [vmem:[#allocation5 + $0x250] ss:$8 sps:$4 sm:$0xff]  }
  0x63   :  { %803 = vmatpush1.bf16.msra.mxu1 %v1585_v37  ;;  %v1641_v14 = vld [vmem:[#allocation5 + $0xd0] ss:$8 sps:$4 sm:$0xff]   ;;  %v1663_v23 = vld [vmem:[#allocation7 + $0x40] sm:$0xff]   ;;  %v1576_v29 = vld [vmem:[#allocation5 + $0x294] ss:$8 sps:$4 sm:$0xff]  }
  0x64   :  { %848 = vmatpush1.bf16.msra.mxu0 %v1508_v15  ;;  %804 = vmatprep.subr.bf16.mxu1 %v1589_v38  ;;  %v1645_v15 = vld [vmem:[#allocation5 + $0xe4] ss:$8 sps:$4 sm:$0xff]   ;;  %v1653_v21 = vld [vmem:[#allocation5 + $0xf0] ss:$8 sps:$4 sm:$0xff]   ;;  %v1588_v37 = vld [vmem:[#allocation5 + $0x2b4] ss:$8 sps:$4 sm:$0xff]  }
  0x65   :  { %849 = vmatprep.subr.bf16.mxu0 %v1509_v16  ;;  %v1558_v16 = vld [vmem:[#allocation5 + $0x264] ss:$8 sps:$4 sm:$0xff]   ;;  %v1562_v22 = vld [vmem:[#allocation5 + $0x270] ss:$8 sps:$4 sm:$0xff]   ;;  %v1662_v4 = vld [vmem:[#allocation2 + $0x18] ss:$0 sps:$4 sm:$0xff]  }
  0x66   :  { %v1570_v24 = vld [vmem:[#allocation5 + $0x284] ss:$8 sps:$4 sm:$0xff]   ;;  %v1668_v34 = vld [vmem:[#allocation7 + $0x10] sm:$0xff]   ;;  %v1670_v38 = vld [vmem:[#allocation7 + $0x18] sm:$0xff]  }
  0x67   :  { %805 = vmatpush1.bf16.msra.mxu1 %v1591_v41  ;;  %v1666_v30 = vld [vmem:[#allocation7 + $0x8] sm:$0xff]   ;;  %v1675_v7 = vld [vmem:[#allocation7 + $0x70] sm:$0xff]  }
  0x68   :  { %850 = vmatpush1.bf16.msra.mxu0 %v1511_v17  ;;  %806 = vmatprep.subr.bf16.mxu1 %v1595_v42  ;;  %v1556_v17 = vld [vmem:[#allocation5 + $0x260] ss:$8 sps:$4 sm:$0xff]   ;;  %v1582_v33 = vld [vmem:[#allocation5 + $0x2a4] ss:$8 sps:$4 sm:$0xff]  }
  0x69   :  { %851 = vmatprep.subr.bf16.mxu0 %v1512_v18  ;;  %v1564_v18 = vld [vmem:[#allocation5 + $0x274] ss:$8 sps:$4 sm:$0xff]   ;;  %v1594_v41 = vld [vmem:[#allocation5 + $0x2c4] ss:$8 sps:$4 sm:$0xff]  }
  0x6a   :  { %v1672_v42 = vld [vmem:[#allocation7 + $0x20] sm:$0xff]  }
  0x6b   :  { %807 = vmatpush1.bf16.msra.mxu1 %v1597_v45  ;;  %v1598_v45 = vld [vmem:[#allocation5 + $0x2d0] ss:$8 sps:$4 sm:$0xff]  }
  0x6c   :  { %852 = vmatpush1.bf16.msra.mxu0 %v1514_v19  ;;  %808 = vmatprep.subr.bf16.mxu1 %v1601_v46  ;;  %v1647_v19 = vld [vmem:[#allocation5 + $0xe0] ss:$8 sps:$4 sm:$0xff]   ;;  %v1606_v46 = vld [vmem:[#allocation5 + $0x2e4] ss:$8 sps:$4 sm:$0xff]  }
  0x6d   :  { %853 = vmatprep.subr.bf16.mxu0 %v1515_v20  ;;  %v1651_v20 = vld [vmem:[#allocation5 + $0xf4] ss:$8 sps:$4 sm:$0xff]  }
  0x6f   :  { %809 = vmatpush1.bf16.msra.mxu1 %v1603_v49  ;;  %v1610_v49 = vld [vmem:[#allocation5 + $0x2f0] ss:$8 sps:$4 sm:$0xff]  }
  0x70   :  { %854 = vmatpush1.bf16.msra.mxu0 %v1517_v25  ;;  %810 = vmatprep.subr.bf16.mxu1 %v1607_v50  ;;  %v1664_v25 = vld [vmem:[#allocation7] sm:$0xff]  }
  0x71   :  { %855 = vmatprep.subr.bf16.mxu0 %v1518_v26  ;;  %v1568_v26 = vld [vmem:[#allocation5 + $0x280] ss:$8 sps:$4 sm:$0xff]   ;;  %v1620_v50 = vld [vmem:[#allocation5 + $0x304] ss:$8 sps:$4 sm:$0xff]  }
  0x73   :  { %811 = vmatpush1.bf16.msra.mxu1 %v1609_v55  ;;  %v1624_v55 = vld [vmem:[#allocation5 + $0x310] ss:$8 sps:$4 sm:$0xff]  }
  0x74   :  { %856 = vmatpush1.bf16.msra.mxu0 %v1520_v28  ;;  %812 = vmatprep.subr.bf16.mxu1 %v1613_v56  ;;  %v1665_v28 = vld [vmem:[#allocation7 + $0x48] sm:$0xff]   ;;  %v1813_v56 = vmov 0  }
  0x75   :  { %857 = vmatprep.subr.bf16.mxu0 %v1521_v31  ;;  %v1574_v31 = vld [vmem:[#allocation5 + $0x290] ss:$8 sps:$4 sm:$0xff]  }
  0x77   :  { %813 = vmatpush1.bf16.msra.mxu1 %v1615_v60  ;;  %v1636_v60 = vld [vmem:[#allocation5 + $0x330] ss:$8 sps:$4 sm:$0xff]  }
  0x78   :  { %858 = vmatpush1.bf16.msra.mxu0 %v1523_v32  ;;  %814 = vmatprep.subr.bf16.mxu1 %v1621_v61  ;;  %v1667_v32 = vld [vmem:[#allocation7 + $0x50] sm:$0xff]   ;;  %v1644_v61 = vld [vmem:[#allocation5 + $0x344] ss:$8 sps:$4 sm:$0xff]  }
  0x79   :  { %859 = vmatprep.subr.bf16.mxu0 %v1524_v35  ;;  %v1580_v35 = vld [vmem:[#allocation5 + $0x2a0] ss:$8 sps:$4 sm:$0xff]  }
  0x7b   :  { %815 = vmatpush1.bf16.msra.mxu1 %v1623_v0  ;;  %v1656_v0 = vld [vmem:[#allocation5 + $0x364] ss:$8 sps:$4 sm:$0xff]  }
  0x7c   :  { %860 = vmatpush1.bf16.msra.mxu0 %v1526_v36  ;;  %816 = vmatprep.subr.bf16.mxu1 %v1627_v1  ;;  %v1669_v36 = vld [vmem:[#allocation7 + $0x58] sm:$0xff]   ;;  %v1654_v1 = vld [vmem:[#allocation5 + $0x360] ss:$8 sps:$4 sm:$0xff]  }
  0x7d   :  { %861 = vmatprep.subr.bf16.mxu0 %v1527_v39  ;;  %v1586_v39 = vld [vmem:[#allocation5 + $0x2b0] ss:$8 sps:$4 sm:$0xff]  }
  0x7f   :  { %817 = vmatpush1.bf16.msra.mxu1 %v1629_v3  ;;  %v1659_v3 = vld [vmem:[#allocation5 + $0x370] ss:$8 sps:$4 sm:$0xff]  }
  0x80   :  { %862 = vmatpush1.bf16.msra.mxu0 %v1529_v40  ;;  %818 = vmatprep.subr.bf16.mxu1 %v1633_v6  ;;  %v1671_v40 = vld [vmem:[#allocation7 + $0x60] sm:$0xff]   ;;  %v1674_v6 = vld [vmem:[#allocation7 + $0x28] sm:$0xff]  }
  0x81   :  { %863 = vmatprep.subr.bf16.mxu0 %v1530_v43  ;;  %v1592_v43 = vld [vmem:[#allocation5 + $0x2c0] ss:$8 sps:$4 sm:$0xff]  }
  0x83   :  { %819 = vmatpush1.bf16.msra.mxu1 %v1635_v10  ;;  %v1678_v10 = vld [vmem:[#allocation7 + $0x38] sm:$0xff]  }
  0x84   :  { %864 = vmatpush1.bf16.msra.mxu0 %v1532_v44  ;;  %820 = vmatprep.subr.bf16.mxu1 %v1639_v11  ;;  %v1600_v44 = vld [vmem:[#allocation5 + $0x2d4] ss:$8 sps:$4 sm:$0xff]   ;;  %v1814_v11 = vmov 0.0  }
  0x85   :  { %865 = vmatprep.subr.bf16.mxu0 %v1533_v47  ;;  %v1604_v47 = vld [vmem:[#allocation5 + $0x2e0] ss:$8 sps:$4 sm:$0xff]  }
  0x87   :  { %821 = vmatpush1.bf16.msra.mxu1 %v1641_v14 }
  0x88   :  { %866 = vmatpush1.bf16.msra.mxu0 %v1535_v48  ;;  %822 = vmatprep.subr.bf16.mxu1 %v1645_v15  ;;  %v1612_v48 = vld [vmem:[#allocation5 + $0x2f4] ss:$8 sps:$4 sm:$0xff]  }
  0x89   :  { %876 = vmatprep.subr.bf16.mxu0 %v1540_v51  ;;  %v1272_v51 = vcombine.low %v1909_v53, %v1909_v53  ;;  %v1642_v53 = vld [vmem:[#allocation5 + $0x340] ss:$8 sps:$4 sm:$0xff]  }
  0x8b   :  { %868 = vmatmul.mubr.bf16.vlgmr.msra.gmra.mrb[0].mxu0 %v1270_v54  ;;  %823 = vmatpush1.bf16.msra.mxu1 %v1647_v19  ;;  %v1626_v54 = vld [vmem:[#allocation5 + $0x314] ss:$8 sps:$4 sm:$0xff]   ;;  %v197_v19 = vld [vmem:[%s1940_s2] sm:$0x3] }
  0x8c   :  { %877 = vmatpush1.bf16.msra.mxu0 %v1538_v52  ;;  %908 = vmatprep.mubr.bf16.mxu0 %v1273_v58  ;;  %v1618_v52 = vld [vmem:[#allocation5 + $0x300] ss:$8 sps:$4 sm:$0xff]  }
  0x8d   :  { %878 = vmatprep.subr.bf16.mxu0 %v1543_v57  ;;  %824 = vmatprep.subr.bf16.mxu1 %v1651_v20  ;;  %v1632_v57 = vld [vmem:[#allocation5 + $0x324] ss:$8 sps:$4 sm:$0xff]   ;;  %v1630_v58 = vld [vmem:[#allocation5 + $0x320] ss:$8 sps:$4 sm:$0xff]  }
  0x8f   :  { %825 = vmatpush1.bf16.msra.mxu1 %v1653_v21 }
  0x90   :  { %879 = vmatpush1.bf16.msra.mxu0 %v1541_v59  ;;  %1413 = vmatprep.subr.bf16.mxu1 %v1663_v23  ;;  %v1638_v59 = vld [vmem:[#allocation5 + $0x334] ss:$8 sps:$4 sm:$0xff]  }
  0x91   :  { %880 = vmatprep.subr.bf16.mxu0 %v1546_v62  ;;  %v1650_v62 = vld [vmem:[#allocation5 + $0x354] ss:$8 sps:$4 sm:$0xff]  }
  0x92   :  { %827 = vmatmul.mubr.bf16.vlgmr.msra.gmra.mrb[0].mxu1 %v1268_v27 }
  0x93   :  { %1414 = vmatpush3.bf16.msra.mxu1 %v1664_v25 }
  0x94   :  { %881 = vmatpush1.bf16.msra.mxu0 %v1544_v63  ;;  %1415 = vmatprep.subr.bf16.mxu1 %v1665_v28  ;;  %v1648_v63 = vld [vmem:[#allocation5 + $0x350] ss:$8 sps:$4 sm:$0xff]  }
  0x95   :  { %882 = vmatprep.subr.bf16.mxu0 %v1549_v2  ;;  %v1661_v2 = vld [vmem:[#allocation5 + $0x374] ss:$8 sps:$4 sm:$0xff]  }
  0x97   :  { %1416 = vmatpush3.bf16.msra.mxu1 %v1666_v30 }
  0x98   :  { %883 = vmatpush1.bf16.msra.mxu0 %v1547_v5  ;;  %1417 = vmatprep.subr.bf16.mxu1 %v1667_v32  ;;  %v1673_v5 = vld [vmem:[#allocation7 + $0x68] sm:$0xff]  }
  0x99   :  { %884 = vmatprep.subr.bf16.mxu0 %v1552_v8  ;;  %v1676_v8 = vld [vmem:[#allocation7 + $0x30] sm:$0xff]  }
  0x9b   :  { %1418 = vmatpush3.bf16.msra.mxu1 %v1668_v34  ;;  %v1679_v34 = vld [vmem:[#allocation8] sm:$0xff]  }
  0x9c   :  { %885 = vmatpush1.bf16.msra.mxu0 %v1550_v9  ;;  %1419 = vmatprep.subr.bf16.mxu1 %v1669_v36  ;;  %v1677_v9 = vld [vmem:[#allocation7 + $0x78] sm:$0xff]   ;;  %v1680_v36 = vld [vmem:[#allocation8 + $0x8] sm:$0xff]  }
  0x9d   :  { %886 = vmatprep.subr.bf16.mxu0 %v1555_v12 }
  0x9f   :  { %1420 = vmatpush3.bf16.msra.mxu1 %v1670_v38  ;;  %v1682_v38 = vld [vmem:[#allocation8 + $0x18] sm:$0xff]  }
  0xa0   :  { %887 = vmatpush1.bf16.msra.mxu0 %v1553_v13  ;;  %1421 = vmatprep.subr.bf16.mxu1 %v1671_v40  ;;  %v1684_v40 = vld [vmem:[#allocation8 + $0x28] sm:$0xff]  }
  0xa1   :  { %888 = vmatprep.subr.bf16.mxu0 %v1558_v16  ;;  %v199_v16 = vlaneseq }
  0xa3   :  { %1422 = vmatpush3.bf16.msra.mxu1 %v1672_v42  ;;  %v1686_v42 = vld [vmem:[#allocation8 + $0x38] sm:$0xff]  }
  0xa4   :  { %889 = vmatpush1.bf16.msra.mxu0 %v1556_v17  ;;  %1423 = vmatprep.subr.bf16.mxu1 %v1673_v5  ;;  %v200_v17 = vshrl.u32 %v199_v16, 7 }
  0xa5   :  { %890 = vmatprep.subr.bf16.mxu0 %v1564_v18 }
  0xa6   :  { %v201_v18 = vsub.s32 0, %v200_v17  ;;  %v205_v20 = vsub.s32 1, %v200_v17 }
  0xa7   :  { %1424 = vmatpush3.bf16.msra.mxu1 %v1674_v6 }
  0xa8   :  { %891 = vmatpush1.bf16.msra.mxu0 %v1562_v22  ;;  %1425 = vmatprep.subr.bf16.mxu1 %v1675_v7  ;;  %v202_v21 = vrot.slane %v197_v19, %v201_v18  ;;  %v206_v22 = vrot.slane %v197_v19, %v205_v20 }
  0xa9   :  { %892 = vmatprep.subr.bf16.mxu0 %v1570_v24 }
  0xab   :  { %1426 = vmatpush3.bf16.msra.mxu1 %v1676_v8 }
  0xac   :  { %893 = vmatpush1.bf16.msra.mxu0 %v1568_v26  ;;  %1427 = vmatprep.subr.bf16.mxu1 %v1677_v9 }
  0xad   :  { %894 = vmatprep.subr.bf16.mxu0 %v1576_v29 }
  0xaf   :  { %1428 = vmatpush3.bf16.msra.mxu1 %v1678_v10 }
  0xb0   :  { %895 = vmatpush1.bf16.msra.mxu0 %v1574_v31  ;;  %1444 = vmatprep.subr.bf16.mxu1 %v1814_v11 }
  0xb1   :  { %896 = vmatprep.subr.bf16.mxu0 %v1582_v33 }
  0xb4   :  { %897 = vmatpush1.bf16.msra.mxu0 %v1580_v35 }
  0xb5   :  { %898 = vmatprep.subr.bf16.mxu0 %v1588_v37  ;;  %v1681_v37 = vld [vmem:[#allocation8 + $0x10] sm:$0xff]  }
  0xb8   :  { %899 = vmatpush1.bf16.msra.mxu0 %v1586_v39  ;;  %v1683_v39 = vld [vmem:[#allocation8 + $0x20] sm:$0xff]  }
  0xb9   :  { %900 = vmatprep.subr.bf16.mxu0 %v1594_v41  ;;  %v1685_v41 = vld [vmem:[#allocation8 + $0x30] sm:$0xff]  }
  0xbc   :  { %901 = vmatpush1.bf16.msra.mxu0 %v1592_v43 }
  0xbd   :  { %902 = vmatprep.subr.bf16.mxu0 %v1600_v44  ;;  %v1387_v44 = vld [vmem:[%s1942_s4] ss:$0 sm:$0xff]  ;;  %s1775_s4 = scalar_lea.vmem %s1258_s8, 128 }
  0xbe   :  { %p1776_p4 = scmp.ne.s32.totalorder %s1258_s8, %s1775_s4  ;;  %p1781_p6 = scmp.lt.s32.totalorder %s1775_s4, %s1775_s4 }
  0xc0   :  { %903 = vmatpush1.bf16.msra.mxu0 %v1598_v45  ;;  %p1782_p7 = por %p1781_p6, %p1780_p5 }
  0xc1   :  { %904 = vmatprep.subr.bf16.mxu0 %v1606_v46 }
  0xc2   :  { %p1783_p8 = pnand %p1782_p7, %p1776_p4 }
  0xc4   :  { %905 = vmatpush1.bf16.msra.mxu0 %v1604_v47 }
  0xc5   :  { %906 = vmatprep.subr.bf16.mxu0 %v1612_v48 }
  0xc8   :  { %907 = vmatpush1.bf16.msra.mxu0 %v1610_v49 }
  0xc9   :  { %917 = vmatprep.subr.bf16.mxu0 %v1620_v50 }
  0xcb   :  { %909 = vmatmul.mubr.bf16.vlgmr.msra.gmra.mrb[0].mxu0 %v1272_v51 }
  0xcc   :  { %918 = vmatpush1.bf16.msra.mxu0 %v1618_v52  ;;  %949 = vmatprep.mubr.bf16.mxu0 %v1813_v56  ;;  %v1404_v52 = vld [vmem:[%s1944_s6] ss:$0 sm:$0xff] }
  0xcd   :  { %919 = vmatprep.subr.bf16.mxu0 %v1626_v54 }
  0xd0   :  { %920 = vmatpush1.bf16.msra.mxu0 %v1624_v55 }
  0xd1   :  { %921 = vmatprep.subr.bf16.mxu0 %v1632_v57 }
  0xd4   :  { %922 = vmatpush1.bf16.msra.mxu0 %v1630_v58 }
  0xd5   :  { %923 = vmatprep.subr.bf16.mxu0 %v1638_v59 }
  0xd8   :  { %924 = vmatpush1.bf16.msra.mxu0 %v1636_v60 }
  0xd9   :  { %925 = vmatprep.subr.bf16.mxu0 %v1644_v61 }
  0xdc   :  { %926 = vmatpush1.bf16.msra.mxu0 %v1642_v53 }
  0xdd   :  { %927 = vmatprep.subr.bf16.mxu0 %v1650_v62 }
  0xe0   :  { %928 = vmatpush1.bf16.msra.mxu0 %v1648_v63 }
  0xe1   :  { %929 = vmatprep.subr.bf16.mxu0 %v1656_v0 }
  0xe4   :  { %930 = vmatpush1.bf16.msra.mxu0 %v1654_v1 }
  0xe5   :  { %931 = vmatprep.subr.bf16.mxu0 %v1661_v2 }
  0xe8   :  { %932 = vmatpush1.bf16.msra.mxu0 %v1659_v3 }
  0xeb   :  { %950 = vmatmul.mubr.bf16.vlgmr.msra.gmra.mrb[0].mxu0 %v1662_v4 }
 0x165   :  { %v828_v12 = vpop.f32.mrb[0].mxu1 }
 0x166   :  { %v830_v13 = vpop.f32.mrb[1].mxu1  ;;  %v829_v23 = vadd.f32 %v828_v12, %v202_v21 }
 0x167   :  { %v832_v14 = vpop.f32.mrb[2].mxu1  ;;  %v831_v24 = vadd.f32 %v830_v13, %v206_v22 }
 0x168   :  { %v833_v15 = vpop.f32.mrb[3].mxu1 }
 0x1be   :  { %v951_v25 = vpop.f32.mrb[0].mxu0 }
 0x1bf   :  { %v1465_v26 = vadd.f32 %v951_v25, %v829_v23  ;;  %v953_v27 = vpop.f32.mrb[1].mxu0 }
 0x1c0   :  { %v1467_v28 = vadd.f32 %v953_v27, %v831_v24  ;;  %v955_v29 = vpop.f32.mrb[2].mxu0 }
 0x1c1   :  { %v958_v30 = vmax.f32 %v1465_v26, 0.0  ;;  %v956_v31 = vpop.f32.mrb[3].mxu0 }
 0x1c2   :  { %v959_v32 = vmax.f32 %v1467_v28, 0.0 }
 0x1c3   :  { %v960_v35 = vpack.c.bf16 %v958_v30, %v958_v30 }
 0x1c4   :  { %v961_v33 = vpack.c.bf16 %v959_v32, %v959_v32 }
 0x1c6   :  { %1129 = vmatprep.mubr.bf16.mxu1 %v961_v33 }
 0x1c7   :  { %1130 = vmatmul.mubr.bf16.vlgmr.msra.gmra.mrb[4].mxu1 %v960_v35 }
 0x1c8   :  { %1445 = vmatpush3.bf16.msra.mxu1 %v1679_v34  ;;  %1460 = vmatprep.mubr.msk.bf16.mxu1 %vm1815_vm0, %v1814_v11 }
 0x1c9   :  { %1446 = vmatprep.subr.bf16.mxu1 %v1814_v11 }
 0x1cc   :  { %1447 = vmatpush3.bf16.msra.mxu1 %v1680_v36 }
 0x1cd   :  { %1448 = vmatprep.subr.bf16.mxu1 %v1814_v11 }
 0x1d0   :  { %1449 = vmatpush3.bf16.msra.mxu1 %v1681_v37 }
 0x1d1   :  { %1450 = vmatprep.subr.bf16.mxu1 %v1814_v11 }
 0x1d4   :  { %1451 = vmatpush3.bf16.msra.mxu1 %v1682_v38 }
 0x1d5   :  { %1452 = vmatprep.subr.bf16.mxu1 %v1814_v11 }
 0x1d8   :  { %1453 = vmatpush3.bf16.msra.mxu1 %v1683_v39 }
 0x1d9   :  { %1454 = vmatprep.subr.bf16.mxu1 %v1814_v11 }
 0x1dc   :  { %1455 = vmatpush3.bf16.msra.mxu1 %v1684_v40 }
 0x1dd   :  { %1456 = vmatprep.subr.bf16.mxu1 %v1814_v11 }
 0x1e0   :  { %1457 = vmatpush3.bf16.msra.mxu1 %v1685_v41 }
 0x1e1   :  { %1458 = vmatprep.subr.bf16.mxu1 %v1814_v11 }
 0x1e4   :  { %1459 = vmatpush3.bf16.msra.mxu1 %v1686_v42 }
 0x29a   :  { %v1429_v43 = vpop.f32.mrb[4].mxu1 }
 0x29b   :  { %v1430_v45 = vpop.f32.mrb[5].mxu1 }
 0x29c   :  { %v1431_v46 = vadd.f32 %v1430_v45, %v1429_v43  ;;  %v1432_v47 = vpop.f32.mrb[6].mxu1 }
 0x29d   :  { %v1433_v48 = vpop.f32.mrb[7].mxu1 }
 0x29e   :  { %v1132_v49 = vadd.f32 %v1431_v46, %v1387_v44 }
 0x2a0   :  { %v1137_v50 = vmax.f32 %v1132_v49, 0.0 }
 0x2a2   :  { %v1138_v51 = vpack.c.bf16 %v1137_v50, %v1137_v50 }
 0x2a4   :  { %1461 = vmatmul.mubr.bf16.vlgmr.msra.gmra.mrb[8].mxu1 %v1138_v51 }
 0x377   :  { %v1244_v54 = vpop.f32.mrb[8].mxu1 }
 0x378   :  { %v1245_v55 = vadd.f32 %v1404_v52, %v1244_v54  ;;  %v1462_v56 = vpop.f32.mrb[9].mxu1 }
 0x379   :  { %v1247_v57 = vpop.f32.mrb[10].mxu1 }
 0x37a   :  { %1250 = vst [vmem:[#allocation10] sm:$0xff] %v1245_v55  ;;  %v1463_v58 = vpop.f32.mrb[11].mxu1 }
 0x37b   :  { %1786 = shalt.err (!%p1783_p8)
}
 0x37c   :  { %s1787_s6 = scalar_lea.hbm %s1945_s7, 128 }
 0x37d   :  { %p1788_p9 = scmp.ne.s32.totalorder %s1945_s7, %s1787_s6  ;;  %p1791_p10 = scmp.lt.u32.totalorder %s1787_s6, %s1945_s7 }
 0x37f   :  { %p1793_p11 = pnand %p1791_p10, %p1788_p9 }
 0x381   :  { %1796 = shalt.err (!%p1793_p11)
}
 0x382   :  { %1260 = dma.vmem_to_hbm [thread:$0]  %s1258_s8, 128, %s1945_s7, [#allocation4]  }
 0x383   :  { %1803 = dma.done.wait [#allocation4], 128  }
 0x384   :  { %1804 = vsyncadd [#allocation4], 4294967168 }
 0x385   :  { %1264 = vsyncpa [#allocation3], 1 }
 0x386   :  { %1265 = vsyncpa [#allocation6], 1 }
 0x387   :  { %1266 = vsyncpa [#allocation9], 1 }
 0x388   :  { %1267 = vsyncpa [#allocation4], 1 }

</bundles_post_ra>
